<compile_context>
chip_gen: v7x
topology: tpu7x:2x2x1
jax: 0.10.0
libtpu: 0.0.40
codegen_flags: <defaults>
</compile_context>

<pallas_src>
import functools

import jax
import jax.numpy as jnp
from jax.experimental import pallas as pl
from jax.experimental.pallas import tpu as pltpu


def _round_up(x, m):
    return (x + m - 1) // m * m


def _default_act_dtype():
    """bf16 tanh on v6e/v7x (bf16 EUP), f32 elsewhere (v5e has no bf16 VPU/EUP)."""
    try:
        kind = jax.devices()[0].device_kind.lower()
    except Exception:
        return jnp.float32
    if "v6" in kind or "v7" in kind:
        return jnp.bfloat16
    return jnp.float32


def _critic_kernel(x_ref, w1_ref, b1_ref, w2_ref, b2_ref, w3_ref, b3_ref, o_ref,
                   *, act_dtype):
    # x_ref:  [TB, S] f32/bf16   w1_ref: [S, H] bf16   b1_ref: [1, H] f32
    # w2_ref: [H, H] bf16        b2_ref: [1, H] f32
    # w3_ref: [1, H] f32         b3_ref: (1, 1) f32 (SMEM scalar)
    # o_ref:  [1, TB] f32        (lane-dense output row for this batch tile)

    x = x_ref[...]
    if x.dtype != jnp.bfloat16:
        x = x.astype(jnp.bfloat16)

    # Layer 1: bf16 operands -> MXU, f32 accumulate; activation in act_dtype.
    h1 = jnp.dot(x, w1_ref[...], preferred_element_type=jnp.float32) + b1_ref[...]
    h1 = jnp.tanh(h1.astype(act_dtype))

    # Layer 2: feed bf16 straight back into the MXU (no extra cast when
    # act_dtype is already bf16).
    h2 = jnp.dot(h1.astype(jnp.bfloat16), w2_ref[...],
                 preferred_element_type=jnp.float32) + b2_ref[...]
    h2 = jnp.tanh(h2.astype(act_dtype)).astype(jnp.float32)

    # Layer 3 (H -> 1): VPU multiply against the broadcast weight row, then a
    # VALU pre-fold of 128-lane slabs before the (XLU) lane reduce.
    h2w = h2 * w3_ref[...]
    H = h2w.shape[-1]
    if H > 128 and H % 128 == 0:
        folded = h2w[:, 0:128]
        for s in range(1, H // 128):
            folded = folded + h2w[:, s * 128:(s + 1) * 128]
        v = jnp.sum(folded, axis=-1)
    else:
        v = jnp.sum(h2w, axis=-1)
    v = v + b3_ref[0, 0]

    # TODO(synk): profile [1,TB] lane-dense store (sublane->lane relayout) vs a
    # [TB,1] masked store; output is tiny so either may win depending on chip.
    o_ref[...] = v[None, :].astype(o_ref.dtype)


def prepare_critic_params(params):
    """One-time cast of the two big weight matrices to bf16 (cache & reuse)."""
    w1, b1, w2, b2, w3_row, b3 = params
    return (w1.astype(jnp.bfloat16), b1, w2.astype(jnp.bfloat16), b2, w3_row, b3)


def critic_forward(state, kernel_params, *, max_batch_tile=1024, act_dtype=None):
    """state: [B, state_dim] float32 -> value: [B] float32 (Critic.forward)."""
    w1_bf, b1, w2_bf, b2, w3_row, b3 = kernel_params
    # Accept raw f32 params too, but the fast path is pre-cast bf16 weights.
    if w1_bf.dtype != jnp.bfloat16:
        w1_bf = w1_bf.astype(jnp.bfloat16)
    if w2_bf.dtype != jnp.bfloat16:
        w2_bf = w2_bf.astype(jnp.bfloat16)
    if act_dtype is None:
        act_dtype = _default_act_dtype()

    B, S = state.shape
    H = w1_bf.shape[1]

    # Batch tile: lane-dense output needs TB % 128 == 0. When the padded batch
    # has at least two 128-blocks, force >=2 grid tiles so the "parallel" axis
    # can shard across v7x's two TensorCores (near-free on 1-TC chips).
    B_align = _round_up(max(B, 1), 128)
    if B_align >= 256:
        tb_cap = max(128, (B_align // 2) // 128 * 128)
    else:
        tb_cap = B_align
    TB = min(max_batch_tile, tb_cap)
    B_pad = _round_up(B, TB)
    num_tiles = B_pad // TB
    if B_pad != B:
        state = jnp.pad(state, ((0, B_pad - B), (0, 0)))

    flops = 2 * B_pad * (S * H + H * H + H)
    transcendentals = 2 * B_pad * H
    bytes_accessed = (B_pad * S * state.dtype.itemsize + S * H * 2 + H * H * 2
                      + 3 * H * 4 + 4 + B_pad * 4)

    # Rough per-step VMEM (double-buffered x/out, resident weights, f32/bf16
    # intermediates). Only raise the scoped limit if we'd exceed v5e's 16 MiB.
    vmem_est = (2 * TB * S * state.dtype.itemsize
                + 2 * (S * H * 2 + H * H * 2 + 3 * H * 4)
                + 2 * TB * 4
                + 4 * TB * H * 4 + 2 * TB * H * 2)
    compiler_kwargs = dict(dimension_semantics=("parallel",))
    if vmem_est > 12 * 1024 * 1024:
        compiler_kwargs["vmem_limit_bytes"] = min(
            int(vmem_est * 3 // 2), 48 * 1024 * 1024)

    out = pl.pallas_call(
        functools.partial(_critic_kernel, act_dtype=act_dtype),
        out_shape=jax.ShapeDtypeStruct((1, B_pad), jnp.float32),
        grid_spec=pltpu.PrefetchScalarGridSpec(
            num_scalar_prefetch=0,
            grid=(num_tiles,),
            in_specs=[
                pl.BlockSpec((TB, S), lambda i: (i, 0)),            # state tile
                pl.BlockSpec((S, H), lambda i: (0, 0)),             # w1 (resident)
                pl.BlockSpec((1, H), lambda i: (0, 0)),             # b1
                pl.BlockSpec((H, H), lambda i: (0, 0)),             # w2
                pl.BlockSpec((1, H), lambda i: (0, 0)),             # b2
                pl.BlockSpec((1, H), lambda i: (0, 0)),             # w3 row
                pl.BlockSpec(memory_space=pltpu.MemorySpace.SMEM),  # b3 scalar
            ],
            out_specs=pl.BlockSpec((1, TB), lambda i: (0, i)),
        ),
        compiler_params=pltpu.CompilerParams(**compiler_kwargs),
        cost_estimate=pl.CostEstimate(
            flops=flops,
            transcendentals=transcendentals,
            bytes_accessed=bytes_accessed),
    )(state, w1_bf, b1, w2_bf, b2, w3_row, b3)

    return out[0, :B]  # squeeze(1) + drop batch padding


def init_critic_params(key, state_dim, hidden_dim=256):
    """Deterministic init mimicking PyTorch nn.Linear default U(-1/sqrt(fan_in), ...)."""
    ks = jax.random.split(key, 6)

    def lin(kw, kb, fan_in, fan_out):
        bound = 1.0 / jnp.sqrt(jnp.float32(fan_in))
        w = jax.random.uniform(kw, (fan_in, fan_out), jnp.float32, -bound, bound)
        b = jax.random.uniform(kb, (1, fan_out), jnp.float32, -bound, bound)
        return w, b

    w1, b1 = lin(ks[0], ks[1], state_dim, hidden_dim)
    w2, b2 = lin(ks[2], ks[3], hidden_dim, hidden_dim)
    w3, b3 = lin(ks[4], ks[5], hidden_dim, 1)   # w3: [H, 1]
    w3_row = w3.T                               # store final weight as [1, H]
    b3 = b3.reshape(1, 1)                       # scalar bias for SMEM
    return (w1, b1, w2, b2, w3_row, b3)


def _critic_ref(state, params):
    """Pure-JAX f32 reference (Critic.forward)."""
    w1, b1, w2, b2, w3_row, b3 = params
    h = jnp.tanh(state @ w1 + b1)
    h = jnp.tanh(h @ w2 + b2)
    return (h @ w3_row.T + b3)[:, 0]


if __name__ == "__main__":
    key = jax.random.PRNGKey(0)
    k_p1, k_x1, k_p2, k_x2 = jax.random.split(key, 4)

    # --- small smoke test ---------------------------------------------------
    B, STATE_DIM, HIDDEN_DIM = 8, 16, 32
    params = init_critic_params(k_p1, STATE_DIM, HIDDEN_DIM)
    kparams = prepare_critic_params(params)           # bf16 weights cached once
    state = jax.random.normal(k_x1, (B, STATE_DIM), jnp.float32)

    value = jax.block_until_ready(critic_forward(state, kparams))
    ref = _critic_ref(state, params)
    assert value.shape == (B,)
    assert jnp.allclose(value, ref, atol=5e-2, rtol=5e-2), float(
        jnp.max(jnp.abs(value - ref)))

    # --- realistic-size check: H=256 exercises the 128-lane pre-fold path,
    # batch padding (B not a multiple of TB), and multi-tile grid -------------
    B2, S2, H2 = 300, 24, 256
    params2 = init_critic_params(k_p2, S2, H2)
    kparams2 = prepare_critic_params(params2)
    state2 = jax.random.normal(k_x2, (B2, S2), jnp.float32)

    value2 = jax.block_until_ready(critic_forward(state2, kparams2))
    ref2 = _critic_ref(state2, params2)
    assert value2.shape == (B2,)
    assert jnp.allclose(value2, ref2, atol=5e-2, rtol=5e-2), float(
        jnp.max(jnp.abs(value2 - ref2)))

    print("KERNEL_OK")
</pallas_src>

<mosaic_0001>
module attributes {stable_mosaic.version = 11 : i64} {
  func.func @_critic_kernel(%arg0: i32, %arg1: memref<128x16xf32, #tpu.memory_space<vmem>>, %arg2: memref<16x32xbf16, #tpu.memory_space<vmem>>, %arg3: memref<1x32xf32, #tpu.memory_space<vmem>>, %arg4: memref<32x32xbf16, #tpu.memory_space<vmem>>, %arg5: memref<1x32xf32, #tpu.memory_space<vmem>>, %arg6: memref<1x32xf32, #tpu.memory_space<vmem>>, %arg7: memref<1x1xf32, #tpu.memory_space<smem>>, %arg8: memref<1x128xf32, #tpu.memory_space<vmem>>) attributes {dimension_semantics = [#tpu.dimension_semantics<parallel>], iteration_bounds = array<i64: 1>, scalar_prefetch = 0 : i64, scratch_operands = 0 : i64, tpu.core_type = #tpu.core_type<tc>, window_params = [{transform_indices = @transform_0, window_bounds = array<i64: 128, 16>}, {pipeline_mode = #tpu.pipeline_mode<synchronous>, transform_indices = @transform_1, window_bounds = array<i64: 16, 32>}, {pipeline_mode = #tpu.pipeline_mode<synchronous>, transform_indices = @transform_2, window_bounds = array<i64: 1, 32>}, {pipeline_mode = #tpu.pipeline_mode<synchronous>, transform_indices = @transform_3, window_bounds = array<i64: 32, 32>}, {pipeline_mode = #tpu.pipeline_mode<synchronous>, transform_indices = @transform_4, window_bounds = array<i64: 1, 32>}, {pipeline_mode = #tpu.pipeline_mode<synchronous>, transform_indices = @transform_5, window_bounds = array<i64: 1, 32>}, {transform_indices = @transform_6, window_bounds = array<i64: 1, 1>}, {transform_indices = @transform_7, window_bounds = array<i64: 1, 128>}]} {
    %c0 = arith.constant 0 : index
    %c0_0 = arith.constant 0 : index
    %0 = vector.load %arg1[%c0, %c0_0] : memref<128x16xf32, #tpu.memory_space<vmem>>, vector<128x16xf32>
    %1 = arith.truncf %0 : vector<128x16xf32> to vector<128x16xbf16>
    %c0_1 = arith.constant 0 : index
    %c0_2 = arith.constant 0 : index
    %2 = vector.load %arg2[%c0_1, %c0_2] : memref<16x32xbf16, #tpu.memory_space<vmem>>, vector<16x32xbf16>
    %cst = arith.constant dense<0.000000e+00> : vector<128x32xf32>
    %3 = tpu.matmul %1, %2, %cst {dimension_numbers = #tpu.dot_dimension_numbers<[1], [0], [0], [1], [0, 0, 1, 1], [], []>} : vector<128x16xbf16>, vector<16x32xbf16>, vector<128x32xf32> -> vector<128x32xf32>
    %c0_3 = arith.constant 0 : index
    %c0_4 = arith.constant 0 : index
    %4 = vector.load %arg3[%c0_3, %c0_4] : memref<1x32xf32, #tpu.memory_space<vmem>>, vector<1x32xf32>
    %5 = vector.broadcast %4 : vector<1x32xf32> to vector<128x32xf32>
    %6 = arith.addf %3, %5 : vector<128x32xf32>
    %7 = math.tanh %6 : vector<128x32xf32>
    %8 = arith.truncf %7 : vector<128x32xf32> to vector<128x32xbf16>
    %c0_5 = arith.constant 0 : index
    %c0_6 = arith.constant 0 : index
    %9 = vector.load %arg4[%c0_5, %c0_6] : memref<32x32xbf16, #tpu.memory_space<vmem>>, vector<32x32xbf16>
    %cst_7 = arith.constant dense<0.000000e+00> : vector<128x32xf32>
    %10 = tpu.matmul %8, %9, %cst_7 {dimension_numbers = #tpu.dot_dimension_numbers<[1], [0], [0], [1], [0, 0, 1, 1], [], []>} : vector<128x32xbf16>, vector<32x32xbf16>, vector<128x32xf32> -> vector<128x32xf32>
    %c0_8 = arith.constant 0 : index
    %c0_9 = arith.constant 0 : index
    %11 = vector.load %arg5[%c0_8, %c0_9] : memref<1x32xf32, #tpu.memory_space<vmem>>, vector<1x32xf32>
    %12 = vector.broadcast %11 : vector<1x32xf32> to vector<128x32xf32>
    %13 = arith.addf %10, %12 : vector<128x32xf32>
    %14 = math.tanh %13 : vector<128x32xf32>
    %c0_10 = arith.constant 0 : index
    %c0_11 = arith.constant 0 : index
    %15 = vector.load %arg6[%c0_10, %c0_11] : memref<1x32xf32, #tpu.memory_space<vmem>>, vector<1x32xf32>
    %16 = vector.broadcast %15 : vector<1x32xf32> to vector<128x32xf32>
    %17 = arith.mulf %14, %16 : vector<128x32xf32>
    %cst_12 = arith.constant dense<0.000000e+00> : vector<128xf32>
    %18 = vector.multi_reduction <add>, %17, %cst_12 [1] : vector<128x32xf32> to vector<128xf32>
    %c0_13 = arith.constant 0 : index
    %c0_14 = arith.constant 0 : index
    %19 = memref.load %arg7[%c0_13, %c0_14] : memref<1x1xf32, #tpu.memory_space<smem>>
    %20 = vector.broadcast %19 : f32 to vector<128xf32>
    %21 = arith.addf %18, %20 : vector<128xf32>
    %22 = vector.shape_cast %21 : vector<128xf32> to vector<1x128xf32>
    %c0_15 = arith.constant 0 : index
    %c0_16 = arith.constant 0 : index
    %23 = vector.load %arg8[%c0_15, %c0_16] : memref<1x128xf32, #tpu.memory_space<vmem>>, vector<1x128xf32>
    tpu.vector_store %arg8[%c0_15, %c0_16], %22 {strides = array<i32>} : memref<1x128xf32, #tpu.memory_space<vmem>>, vector<1x128xf32>,
    return
  }
  func.func @transform_0(%arg0: i32) -> (i32, i32) {
    %c0_i32 = arith.constant 0 : i32
    %c0_i32_0 = arith.constant 0 : i32
    return %arg0, %c0_i32 : i32, i32
  }
  func.func @transform_1(%arg0: i32) -> (i32, i32) {
    %c0_i32 = arith.constant 0 : i32
    %c0_i32_0 = arith.constant 0 : i32
    %c0_i32_1 = arith.constant 0 : i32
    return %c0_i32, %c0_i32_0 : i32, i32
  }
  func.func @transform_2(%arg0: i32) -> (i32, i32) {
    %c0_i32 = arith.constant 0 : i32
    %c0_i32_0 = arith.constant 0 : i32
    %c0_i32_1 = arith.constant 0 : i32
    return %c0_i32, %c0_i32_0 : i32, i32
  }
  func.func @transform_3(%arg0: i32) -> (i32, i32) {
    %c0_i32 = arith.constant 0 : i32
    %c0_i32_0 = arith.constant 0 : i32
    %c0_i32_1 = arith.constant 0 : i32
    return %c0_i32, %c0_i32_0 : i32, i32
  }
  func.func @transform_4(%arg0: i32) -> (i32, i32) {
    %c0_i32 = arith.constant 0 : i32
    %c0_i32_0 = arith.constant 0 : i32
    %c0_i32_1 = arith.constant 0 : i32
    return %c0_i32, %c0_i32_0 : i32, i32
  }
  func.func @transform_5(%arg0: i32) -> (i32, i32) {
    %c0_i32 = arith.constant 0 : i32
    %c0_i32_0 = arith.constant 0 : i32
    %c0_i32_1 = arith.constant 0 : i32
    return %c0_i32, %c0_i32_0 : i32, i32
  }
  func.func @transform_6(%arg0: i32) -> (i32, i32) {
    %c0_i32 = arith.constant 0 : i32
    %c0_i32_0 = arith.constant 0 : i32
    %c0_i32_1 = arith.constant 0 : i32
    return %c0_i32, %c0_i32_0 : i32, i32
  }
  func.func @transform_7(%arg0: i32) -> (i32, i32) {
    %c0_i32 = arith.constant 0 : i32
    %c0_i32_0 = arith.constant 0 : i32
    return %c0_i32, %arg0 : i32, i32
  }
}

</mosaic_0001>

<bundles_post_ra>
// kernel: tpu_custom_call.1
= control target key start
LH: loop header
LB: loop body
LE: loop exit
PB: predicated region body
PF: predicated region fallthrough
CT: control target
= control target key end

     0   :  { %vm68_vm0 = vcmask 130048   ;;  %s1026_s0 = inlined_call_operand.vmem [shape: f32[128,16], index: 0, kind: input, shape index: {}]   ;;  %s1027_s1 = inlined_call_operand.vmem [shape: bf16[16,32], index: 1, kind: input, shape index: {}]   ;;  %s1028_s2 = inlined_call_operand.vmem [shape: f32[1,32], index: 2, kind: input, shape index: {}]   ;;  %s1029_s3 = inlined_call_operand.vmem [shape: bf16[32,32], index: 3, kind: input, shape index: {}]   ;;  %s1030_s4 = inlined_call_operand.vmem [shape: f32[1,32], index: 4, kind: input, shape index: {}]   ;;  %s1031_s5 = inlined_call_operand.vmem [shape: f32[1,32], index: 5, kind: input, shape index: {}]   ;;  %s1032_s6 = inlined_call_operand.<no memory space> [shape: f32[1,1], index: 6, kind: input, shape index: {}]   ;;  %s1033_s7 = inlined_call_operand.hbm [shape: f32[1,128], index: 7, kind: output, shape index: {}]  }
   0x1   :  { %v687_v0 = vld [vmem:[%s1027_s1] sm:$0xff]   ;;  %v30_v2 = vld [vmem:[%s1026_s0 + $0x8] sm:$0xff]  ;;  %v31_v3 = vld [vmem:[%s1026_s0 + $0x10] sm:$0xff] }
   0x2   :  { %v29_v1 = vld [vmem:[%s1026_s0] sm:$0xff]  ;;  %648 = vmatprep.subr.bf16.mxu0 %v687_v0  ;;  %v32_v5 = vld [vmem:[%s1026_s0 + $0x18] sm:$0xff]  ;;  %v34_v7 = vld [vmem:[%s1026_s0 + $0x28] sm:$0xff] }
   0x3   :  { %v45_v4 = vpack.c.bf16 %v30_v2, %v29_v1  ;;  %v33_v6 = vld [vmem:[%s1026_s0 + $0x20] sm:$0xff]  ;;  %649 = vmatpush3.bf16.msra.mxu0 %v687_v0  ;;  %v46_v8 = vpack.c.bf16 %v32_v5, %v31_v3  ;;  %v35_v10 = vld [vmem:[%s1026_s0 + $0x30] sm:$0xff]  ;;  %v36_v11 = vld [vmem:[%s1026_s0 + $0x38] sm:$0xff] }
   0x4   :  { %v47_v9 = vpack.c.bf16 %v34_v7, %v33_v6 }
   0x5   :  { %650 = vmatprep.mubr.msk.bf16.mxu0 %vm68_vm0, %v45_v4 }
   0x6   :  { %651 = vmatmul.mubr.msk.bf16.vlgmr.msra.gmra.mrb[0].mxu0 %vm68_vm0, %v46_v8 }
   0x7   :  { %654 = vmatprep.mubr.msk.bf16.mxu0 %vm68_vm0, %v47_v9 }
   0x8   :  { %13 = vsyncpa [#allocation4], 0  ;;  %v37_v12 = vld [vmem:[%s1026_s0 + $0x40] sm:$0xff]  ;;  %v38_v13 = vld [vmem:[%s1026_s0 + $0x48] sm:$0xff]  ;;  %v48_v14 = vpack.c.bf16 %v36_v11, %v35_v10  ;;  %vm237_vm1 = vcmask 261120   ;;  %vm491_vm2 = vcmask 130112  }
   0x9   :  { %v49_v15 = vpack.c.bf16 %v38_v13, %v37_v12  ;;  %v39_v16 = vld [vmem:[%s1026_s0 + $0x50] sm:$0xff]  ;;  %v40_v17 = vld [vmem:[%s1026_s0 + $0x58] sm:$0xff]  ;;  %v41_v18 = vld [vmem:[%s1026_s0 + $0x60] sm:$0xff]  ;;  %vm498_vm3 = vcmask 195712   ;;  %vm505_vm4 = vcmask 261312   ;;  %vm512_vm5 = vcmask 326912  }
   0xa   :  { %v42_v19 = vld [vmem:[%s1026_s0 + $0x68] sm:$0xff]  ;;  %v50_v20 = vpack.c.bf16 %v40_v17, %v39_v16  ;;  %v43_v22 = vld [vmem:[%s1026_s0 + $0x70] sm:$0xff]  ;;  %v44_v23 = vld [vmem:[%s1026_s0 + $0x78] sm:$0xff]  ;;  %vm519_vm6 = vcmask 392512   ;;  %vm526_vm7 = vcmask 458112   ;;  %vm533_vm8 = vcmask 523712  }
   0xb   :  { %v51_v21 = vpack.c.bf16 %v42_v19, %v41_v18  ;;  %v52_v24 = vpack.c.bf16 %v44_v23, %v43_v22  ;;  %v688_v25 = vld [vmem:[%s1029_s3] sm:$0xff]   ;;  %v689_v26 = vld [vmem:[%s1029_s3 + $0x8] sm:$0xff]   ;;  %vm540_vm9 = vcmask 589312   ;;  %vm547_vm10 = vcmask 654912  }
   0xc   :  { %666 = vmatprep.subr.bf16.mxu1 %v688_v25  ;;  %v607_v27 = vld [vmem:[%s1028_s2] ss:$0 sm:$0xff]  ;;  %vm554_vm11 = vcmask 720512   ;;  %vm561_vm12 = vcmask 786112   ;;  %vm568_vm13 = vcmask 851712   ;;  %vm575_vm14 = vcmask 917312  }
   0xd   :  { %667 = vmatpush3.bf16.msra.mxu1 %v688_v25  ;;  %vm582_vm15 = vcmask 982912  }
   0xe   :  { %655 = vmatmul.mubr.msk.bf16.gmra.mrb[4].mxu0 %vm68_vm0, %v48_v14  ;;  %668 = vmatprep.subr.bf16.mxu1 %v689_v26 }
   0xf   :  { %658 = vmatprep.mubr.msk.bf16.mxu0 %vm68_vm0, %v49_v15 }
  0x11   :  { %669 = vmatpush3.bf16.msra.mxu1 %v689_v26 }
  0x16   :  { %659 = vmatmul.mubr.msk.bf16.gmra.mrb[8].mxu0 %vm68_vm0, %v50_v20  ;;  %v898_v20 = vld [vmem:[%s1030_s4] ss:$0 sm:$0xff] }
  0x17   :  { %662 = vmatprep.mubr.msk.bf16.mxu0 %vm68_vm0, %v51_v21 }
  0x1e   :  { %663 = vmatmul.mubr.msk.bf16.gmra.mrb[12].mxu0 %vm68_vm0, %v52_v24  ;;  %vm589_vm0 = vcmask 1048512  }
  0xd9   :  { %v652_v28 = vpop.f32.mrb[0].mxu0 }
  0xda   :  { %v136_v29 = vadd.f32 %v652_v28, %v607_v27  ;;  %v127_v30 = vpop.f32.mrb[1].mxu0 }
  0xdb   :  { %v128_v31 = vadd.f32 %v607_v27, %v127_v30  ;;  %v653_v32 = vpop.f32.mrb[2].mxu0 }
  0xdc   :  { %690 = vtanh.f32 %v136_v29  ;;  %v139_v33 = vadd.f32 %v653_v32, %v607_v27  ;;  %v130_v34 = vpop.f32.mrb[3].mxu0 }
  0xdd   :  { %692 = vtanh.f32 %v128_v31  ;;  %v131_v35 = vadd.f32 %v607_v27, %v130_v34 }
  0xde   :  { %694 = vtanh.f32 %v139_v33 }
  0xdf   :  { %696 = vtanh.f32 %v131_v35 }
  0xe1   :  { %v656_v36 = vpop.f32.mrb[4].mxu0 }
  0xe2   :  { %v152_v37 = vadd.f32 %v656_v36, %v607_v27  ;;  %v143_v38 = vpop.f32.mrb[5].mxu0  ;;  %v910_v36 = vld [vmem:[%s1031_s5] ss:$0 sm:$0xff] }
  0xe3   :  { %v144_v39 = vadd.f32 %v607_v27, %v143_v38  ;;  %v657_v40 = vpop.f32.mrb[6].mxu0 }
  0xe4   :  { %698 = vtanh.f32 %v152_v37  ;;  %v155_v41 = vadd.f32 %v657_v40, %v607_v27  ;;  %v146_v42 = vpop.f32.mrb[7].mxu0 }
  0xe5   :  { %700 = vtanh.f32 %v144_v39  ;;  %v147_v43 = vadd.f32 %v607_v27, %v146_v42 }
  0xe6   :  { %v691_v44 = vpop.eup %690  ;;  %702 = vtanh.f32 %v155_v41 }
  0xe7   :  { %v693_v45 = vpop.eup %692  ;;  %704 = vtanh.f32 %v147_v43 }
  0xe8   :  { %v695_v46 = vpop.eup %694 }
  0xe9   :  { %v697_v47 = vpop.eup %696  ;;  %v660_v48 = vpop.f32.mrb[8].mxu0  ;;  %v207_v49 = vpack.c.bf16 %v695_v46, %v691_v44 }
  0xea   :  { %v168_v50 = vadd.f32 %v660_v48, %v607_v27  ;;  %v159_v51 = vpop.f32.mrb[9].mxu0  ;;  %v206_v52 = vpack.c.bf16 %v697_v47, %v693_v45 }
  0xeb   :  { %v160_v53 = vadd.f32 %v607_v27, %v159_v51  ;;  %v661_v54 = vpop.f32.mrb[10].mxu0 }
  0xec   :  { %706 = vtanh.f32 %v168_v50  ;;  %v171_v55 = vadd.f32 %v661_v54, %v607_v27  ;;  %v162_v56 = vpop.f32.mrb[11].mxu0  ;;  %670 = vmatprep.mubr.msk.bf16.mxu1 %vm237_vm1, %v206_v52 }
  0xed   :  { %708 = vtanh.f32 %v160_v53  ;;  %v163_v57 = vadd.f32 %v607_v27, %v162_v56  ;;  %671 = vmatmul.mubr.msk.bf16.vlgmr.msra.gmra.mrb[0].mxu1 %vm237_vm1, %v207_v49 }
  0xee   :  { %v699_v58 = vpop.eup %698  ;;  %710 = vtanh.f32 %v171_v55 }
  0xef   :  { %v701_v59 = vpop.eup %700  ;;  %712 = vtanh.f32 %v163_v57 }
  0xf0   :  { %v703_v60 = vpop.eup %702 }
  0xf1   :  { %v705_v61 = vpop.eup %704  ;;  %v664_v62 = vpop.f32.mrb[12].mxu0  ;;  %v209_v63 = vpack.c.bf16 %v703_v60, %v699_v58 }
  0xf2   :  { %v184_v0 = vadd.f32 %v664_v62, %v607_v27  ;;  %v175_v1 = vpop.f32.mrb[13].mxu0  ;;  %v208_v2 = vpack.c.bf16 %v705_v61, %v701_v59 }
  0xf3   :  { %v176_v3 = vadd.f32 %v607_v27, %v175_v1  ;;  %v665_v4 = vpop.f32.mrb[14].mxu0 }
  0xf4   :  { %714 = vtanh.f32 %v184_v0  ;;  %v187_v5 = vadd.f32 %v665_v4, %v607_v27  ;;  %v178_v6 = vpop.f32.mrb[15].mxu0  ;;  %674 = vmatprep.mubr.msk.bf16.mxu1 %vm237_vm1, %v208_v2 }
  0xf5   :  { %716 = vtanh.f32 %v176_v3  ;;  %v179_v7 = vadd.f32 %v607_v27, %v178_v6  ;;  %675 = vmatmul.mubr.msk.bf16.gmra.mrb[4].mxu1 %vm237_vm1, %v209_v63 }
  0xf6   :  { %v707_v8 = vpop.eup %706  ;;  %718 = vtanh.f32 %v187_v5 }
  0xf7   :  { %v709_v9 = vpop.eup %708  ;;  %720 = vtanh.f32 %v179_v7 }
  0xf8   :  { %v711_v10 = vpop.eup %710 }
  0xf9   :  { %v713_v11 = vpop.eup %712  ;;  %v211_v12 = vpack.c.bf16 %v711_v10, %v707_v8 }
  0xfa   :  { %v210_v13 = vpack.c.bf16 %v713_v11, %v709_v9 }
  0xfc   :  { %678 = vmatprep.mubr.msk.bf16.mxu1 %vm237_vm1, %v210_v13 }
  0xfd   :  { %679 = vmatmul.mubr.msk.bf16.gmra.mrb[8].mxu1 %vm237_vm1, %v211_v12 }
  0xfe   :  { %v715_v14 = vpop.eup %714 }
  0xff   :  { %v717_v15 = vpop.eup %716 }
 0x100   :  { %v719_v16 = vpop.eup %718 }
 0x101   :  { %v721_v17 = vpop.eup %720  ;;  %v213_v18 = vpack.c.bf16 %v719_v16, %v715_v14 }
 0x102   :  { %v212_v19 = vpack.c.bf16 %v721_v17, %v717_v15 }
 0x104   :  { %682 = vmatprep.mubr.msk.bf16.mxu1 %vm237_vm1, %v212_v19 }
 0x105   :  { %683 = vmatmul.mubr.msk.bf16.gmra.mrb[12].mxu1 %vm237_vm1, %v213_v18 }
 0x1c0   :  { %v672_v21 = vpop.f32.mrb[0].mxu1 }
 0x1c1   :  { %v305_v22 = vadd.f32 %v672_v21, %v898_v20  ;;  %v296_v23 = vpop.f32.mrb[1].mxu1 }
 0x1c2   :  { %v297_v24 = vadd.f32 %v898_v20, %v296_v23  ;;  %v673_v25 = vpop.f32.mrb[2].mxu1 }
 0x1c3   :  { %722 = vtanh.f32 %v305_v22  ;;  %v308_v26 = vadd.f32 %v673_v25, %v898_v20  ;;  %v299_v27 = vpop.f32.mrb[3].mxu1 }
 0x1c4   :  { %724 = vtanh.f32 %v297_v24  ;;  %v300_v28 = vadd.f32 %v898_v20, %v299_v27 }
 0x1c5   :  { %726 = vtanh.f32 %v308_v26 }
 0x1c6   :  { %728 = vtanh.f32 %v300_v28 }
 0x1c8   :  { %v676_v29 = vpop.f32.mrb[4].mxu1 }
 0x1c9   :  { %v321_v30 = vadd.f32 %v676_v29, %v898_v20  ;;  %v312_v31 = vpop.f32.mrb[5].mxu1 }
 0x1ca   :  { %v313_v32 = vadd.f32 %v898_v20, %v312_v31  ;;  %v677_v33 = vpop.f32.mrb[6].mxu1 }
 0x1cb   :  { %730 = vtanh.f32 %v321_v30  ;;  %v324_v34 = vadd.f32 %v677_v33, %v898_v20  ;;  %v315_v35 = vpop.f32.mrb[7].mxu1 }
 0x1cc   :  { %732 = vtanh.f32 %v313_v32  ;;  %v316_v37 = vadd.f32 %v898_v20, %v315_v35 }
 0x1cd   :  { %v723_v38 = vpop.eup %722  ;;  %734 = vtanh.f32 %v324_v34 }
 0x1ce   :  { %v725_v39 = vpop.eup %724  ;;  %736 = vtanh.f32 %v316_v37  ;;  %v384_v40 = vmul.f32 %v723_v38, %v910_v36 }
 0x1cf   :  { %v727_v41 = vpop.eup %726  ;;  %v382_v42 = vmul.f32 %v725_v39, %v910_v36  ;;  %v480_v39 = vlaneseq }
 0x1d0   :  { %v729_v43 = vpop.eup %728  ;;  %v680_v44 = vpop.f32.mrb[8].mxu1  ;;  %v404_v45 = vsel %vm237_vm1, %v384_v40, 0.0  ;;  %v385_v46 = vmul.f32 %v727_v41, %v910_v36 }
 0x1d1   :  { %v337_v47 = vadd.f32 %v680_v44, %v898_v20  ;;  %405 = vadd.xlane.f32.xlu1 %v404_v45  ;;  %v328_v48 = vpop.f32.mrb[9].mxu1  ;;  %v398_v49 = vsel %vm237_vm1, %v382_v42, 0.0  ;;  %v383_v50 = vmul.f32 %v729_v43, %v910_v36  ;;  %v953_v40 = vand.u32 127, %v480_v39 }
 0x1d2   :  { %v329_v51 = vadd.f32 %v898_v20, %v328_v48  ;;  %v681_v52 = vpop.f32.mrb[10].mxu1  ;;  %399 = vadd.xlane.f32.xlu0 %v398_v49  ;;  %v407_v56 = vsel %vm237_vm1, %v385_v46, 0.0  ;;  %v956_v43 = vshrl.u32 %v480_v39, 7 }
 0x1d3   :  { %738 = vtanh.f32 %v337_v47  ;;  %v340_v53 = vadd.f32 %v681_v52, %v898_v20  ;;  %v331_v54 = vpop.f32.mrb[11].mxu1  ;;  %v401_v58 = vsel %vm237_vm1, %v383_v50, 0.0  ;;  %v486_v42 = vadd.s32 4294967288, %v953_v40 }
 0x1d4   :  { %740 = vtanh.f32 %v329_v51  ;;  %v332_v55 = vadd.f32 %v898_v20, %v331_v54  ;;  %v493_v45 = vadd.s32 4294967280, %v953_v40  ;;  %v484_v47 = vsub.s32 %v953_v40, %v956_v43 }
 0x1d5   :  { %v731_v57 = vpop.eup %730  ;;  %742 = vtanh.f32 %v340_v53  ;;  %408 = vadd.xlane.f32.xlu1 %v407_v56  ;;  %v489_v46 = vsub.s32 %v486_v42, %v956_v43  ;;  %v500_v53 = vadd.s32 4294967272, %v953_v40  ;;  %v507_v56 = vadd.s32 4294967264, %v953_v40 }
 0x1d6   :  { %v733_v59 = vpop.eup %732  ;;  %744 = vtanh.f32 %v332_v55  ;;  %402 = vadd.xlane.f32.xlu0 %v401_v58  ;;  %v388_v60 = vmul.f32 %v731_v57, %v910_v36  ;;  %v496_v52 = vsub.s32 %v493_v45, %v956_v43 }
 0x1d7   :  { %v735_v61 = vpop.eup %734  ;;  %v386_v4 = vmul.f32 %v733_v59, %v910_v36  ;;  %v514_v59 = vadd.s32 4294967256, %v953_v40 }
 0x1d8   :  { %v737_v62 = vpop.eup %736  ;;  %v684_v63 = vpop.f32.mrb[12].mxu1  ;;  %v416_v0 = vsel %vm237_vm1, %v388_v60, 0.0  ;;  %v389_v1 = vmul.f32 %v735_v61, %v910_v36  ;;  %v521_v60 = vadd.s32 4294967248, %v953_v40 }
 0x1d9   :  { %v353_v2 = vadd.f32 %v684_v63, %v898_v20  ;;  %v344_v3 = vpop.f32.mrb[13].mxu1  ;;  %v387_v8 = vmul.f32 %v737_v62, %v910_v36  ;;  %v410_v13 = vsel %vm237_vm1, %v386_v4, 0.0  ;;  %v503_v62 = vsub.s32 %v500_v53, %v956_v43 }
 0x1da   :  { %v345_v5 = vadd.f32 %v898_v20, %v344_v3  ;;  %v685_v6 = vpop.f32.mrb[14].mxu1  ;;  %417 = vadd.xlane.f32.xlu0 %v416_v0  ;;  %v419_v7 = vsel %vm237_vm1, %v389_v1, 0.0  ;;  %v528_v3 = vadd.s32 4294967240, %v953_v40 }
 0x1db   :  { %746 = vtanh.f32 %v353_v2  ;;  %v356_v9 = vadd.f32 %v685_v6, %v898_v20  ;;  %420 = vadd.xlane.f32.xlu1 %v419_v7  ;;  %v347_v10 = vpop.f32.mrb[15].mxu1  ;;  %v413_v15 = vsel %vm237_vm1, %v387_v8, 0.0  ;;  %v510_v2 = vsub.s32 %v507_v56, %v956_v43 }
 0x1dc   :  { %748 = vtanh.f32 %v345_v5  ;;  %v348_v11 = vadd.f32 %v898_v20, %v347_v10  ;;  %v517_v5 = vsub.s32 %v514_v59, %v956_v43  ;;  %v524_v7 = vsub.s32 %v521_v60, %v956_v43 }
 0x1dd   :  { %v739_v12 = vpop.eup %738  ;;  %750 = vtanh.f32 %v356_v9 }
 0x1de   :  { %v741_v14 = vpop.eup %740  ;;  %752 = vtanh.f32 %v348_v11  ;;  %411 = vadd.xlane.f32.xlu0 %v410_v13  ;;  %v392_v16 = vmul.f32 %v739_v12, %v910_v36  ;;  %v549_v12 = vadd.s32 4294967216, %v953_v40 }
 0x1df   :  { %v743_v17 = vpop.eup %742  ;;  %414 = vadd.xlane.f32.xlu1 %v413_v15  ;;  %v390_v20 = vmul.f32 %v741_v14, %v910_v36  ;;  %v535_v15 = vadd.s32 4294967232, %v953_v40 }
 0x1e0   :  { %v745_v18 = vpop.eup %744  ;;  %v428_v19 = vsel %vm237_vm1, %v392_v16, 0.0  ;;  %v393_v21 = vmul.f32 %v743_v17, %v910_v36 }
 0x1e1   :  { %v391_v23 = vmul.f32 %v745_v18, %v910_v36  ;;  %v422_v25 = vsel %vm237_vm1, %v390_v20, 0.0 }
 0x1e2   :  { %429 = vadd.xlane.f32.xlu0 %v428_v19  ;;  %v431_v22 = vsel %vm237_vm1, %v393_v21, 0.0  ;;  %v556_v19 = vadd.s32 4294967208, %v953_v40  ;;  %v542_v21 = vadd.s32 4294967224, %v953_v40 }
 0x1e3   :  { %432 = vadd.xlane.f32.xlu1 %v431_v22  ;;  %v425_v27 = vsel %vm237_vm1, %v391_v23, 0.0  ;;  %v531_v23 = vsub.s32 %v528_v3, %v956_v43 }
 0x1e5   :  { %v747_v24 = vpop.eup %746 }
 0x1e6   :  { %v749_v26 = vpop.eup %748  ;;  %423 = vadd.xlane.f32.xlu0 %v422_v25  ;;  %v396_v33 = vmul.f32 %v747_v24, %v910_v36 }
 0x1e7   :  { %v751_v28 = vpop.eup %750  ;;  %426 = vadd.xlane.f32.xlu1 %v425_v27  ;;  %v394_v29 = vmul.f32 %v749_v26, %v910_v36  ;;  %v552_v27 = vsub.s32 %v549_v12, %v956_v43 }
 0x1e8   :  { %v753_v30 = vpop.eup %752  ;;  %v397_v35 = vmul.f32 %v751_v28, %v910_v36  ;;  %v440_v37 = vsel %vm237_vm1, %v396_v33, 0.0  ;;  %v538_v28 = vsub.s32 %v535_v15, %v956_v43  ;;  %v570_v33 = vadd.s32 4294967192, %v953_v40 }
 0x1e9   :  { %v434_v31 = vsel %vm237_vm1, %v394_v29, 0.0  ;;  %v395_v32 = vmul.f32 %v753_v30, %v910_v36  ;;  %v961_v36 = vstv %s1032_s6  ;;  %v563_v29 = vadd.s32 4294967200, %v953_v40  ;;  %s778_s6 = smov [#allocation3]  }
 0x1ea   :  { %435 = vadd.xlane.f32.xlu0 %v434_v31  ;;  %v443_v38 = vsel %vm237_vm1, %v397_v35, 0.0  ;;  %v559_v30 = vsub.s32 %v556_v19, %v956_v43  ;;  %s599_s17 = sshll.u32 %s778_s6, 4  ;;  %s600_s17 = int_to_ptr.vmem [resolvable:$true] %s599_s17 }
 0x1eb   :  { %v437_v34 = vsel %vm237_vm1, %v395_v32, 0.0  ;;  %v545_v32 = vsub.s32 %v542_v21, %v956_v43  ;;  %v566_v45 = vsub.s32 %v563_v29, %v956_v43  ;;  %s754_s18 = scalar_lea.vmem %s600_s17, 16  ;;  %s758_s19 = scalar_lea.vmem %s600_s17, 32 }
 0x1ec   :  { %438 = vadd.xlane.f32.xlu1 %v437_v34  ;;  %p755_p0 = scmp.ne.s32.totalorder %s600_s17, %s754_s18  ;;  %p759_p1 = scmp.lt.s32.totalorder %s600_s17, %s600_s17 }
 0x1ed   :  { %p760_p2 = scmp.lt.s32.totalorder %s758_s19, %s754_s18 }
 0x1ee   :  { %441 = vadd.xlane.f32.xlu0 %v440_v37 }
 0x1ef   :  { %p761_p3 = por %p760_p2, %p759_p1 }
 0x1f0   :  { %444 = vadd.xlane.f32.xlu1 %v443_v38 }
 0x1f1   :  { %p762_p4 = pnand %p761_p3, %p755_p0 }
 0x25e   :  { %v406_v41 = vpop.xlane.xlu1 %405 }
 0x25f   :  { %v400_v44 = vpop.xlane.xlu0 %399  ;;  %v450_v54 = vadd.f32 %v961_v36, %v406_v41 }
 0x260   :  { %v448_v48 = vadd.f32 %v961_v36, %v400_v44 }
 0x261   :  { %v497_v1 = vrot.slane %v450_v54, %v496_v52  ;;  %v584_v54 = vadd.s32 4294967176, %v953_v40 }
 0x262   :  { %v409_v50 = vpop.xlane.xlu1 %408  ;;  %v485_v57 = vrot.slane %v448_v48, %v484_v47 }
 0x263   :  { %v403_v49 = vpop.xlane.xlu0 %402  ;;  %v451_v63 = vadd.f32 %v961_v36, %v409_v50  ;;  %v573_v50 = vsub.s32 %v570_v33, %v956_v43 }
 0x264   :  { %v449_v51 = vadd.f32 %v961_v36, %v403_v49 }
 0x265   :  { %v504_v10 = vrot.slane %v451_v63, %v503_v62 }
 0x266   :  { %v490_v55 = vrot.slane %v449_v51, %v489_v46  ;;  %v577_v46 = vadd.s32 4294967184, %v953_v40  ;;  %v587_v40 = vsub.s32 %v584_v54, %v956_v43 }
 0x267   :  { %v418_v58 = vpop.xlane.xlu0 %417 }
 0x268   :  { %v421_v61 = vpop.xlane.xlu1 %420  ;;  %v492_v0 = vsel %vm491_vm2, %v490_v55, %v485_v57  ;;  %v454_v13 = vadd.f32 %v961_v36, %v418_v58 }
 0x269   :  { %v499_v6 = vsel %vm498_vm3, %v497_v1, %v492_v0  ;;  %v455_v24 = vadd.f32 %v961_v36, %v421_v61  ;;  %v580_v61 = vsub.s32 %v577_v46, %v956_v43 }
 0x26a   :  { %v506_v16 = vsel %vm505_vm4, %v504_v10, %v499_v6  ;;  %v525_v26 = vrot.slane %v454_v13, %v524_v7 }
 0x26b   :  { %v412_v4 = vpop.xlane.xlu0 %411  ;;  %v532_v39 = vrot.slane %v455_v24, %v531_v23 }
 0x26c   :  { %v452_v8 = vadd.f32 %v961_v36, %v412_v4  ;;  %v415_v9 = vpop.xlane.xlu1 %414 }
 0x26d   :  { %v453_v11 = vadd.f32 %v961_v36, %v415_v9 }
 0x26e   :  { %v511_v14 = vrot.slane %v452_v8, %v510_v2 }
 0x26f   :  { %v518_v17 = vrot.slane %v453_v11, %v517_v5  ;;  %v430_v18 = vpop.xlane.xlu0 %429 }
 0x270   :  { %v513_v20 = vsel %vm512_vm5, %v511_v14, %v506_v16  ;;  %v433_v22 = vpop.xlane.xlu1 %432  ;;  %v458_v35 = vadd.f32 %v961_v36, %v430_v18 }
 0x271   :  { %v520_v25 = vsel %vm519_vm6, %v518_v17, %v513_v20  ;;  %v459_v41 = vadd.f32 %v961_v36, %v433_v22 }
 0x272   :  { %v527_v34 = vsel %vm526_vm7, %v525_v26, %v520_v25  ;;  %v553_v51 = vrot.slane %v458_v35, %v552_v27 }
 0x273   :  { %v424_v31 = vpop.xlane.xlu0 %423  ;;  %v534_v47 = vsel %vm533_vm8, %v532_v39, %v527_v34  ;;  %v560_v55 = vrot.slane %v459_v41, %v559_v30 }
 0x274   :  { %v456_v37 = vadd.f32 %v961_v36, %v424_v31  ;;  %v427_v38 = vpop.xlane.xlu1 %426 }
 0x275   :  { %v457_v42 = vadd.f32 %v961_v36, %v427_v38 }
 0x276   :  { %v539_v44 = vrot.slane %v456_v37, %v538_v28 }
 0x277   :  { %v546_v48 = vrot.slane %v457_v42, %v545_v32  ;;  %v436_v49 = vpop.xlane.xlu0 %435 }
 0x278   :  { %v541_v52 = vsel %vm540_vm9, %v539_v44, %v534_v47  ;;  %v460_v53 = vadd.f32 %v961_v36, %v436_v49 }
 0x279   :  { %v548_v56 = vsel %vm547_vm10, %v546_v48, %v541_v52  ;;  %v439_v57 = vpop.xlane.xlu1 %438 }
 0x27a   :  { %v555_v58 = vsel %vm554_vm11, %v553_v51, %v548_v56  ;;  %v567_v59 = vrot.slane %v460_v53, %v566_v45  ;;  %v461_v60 = vadd.f32 %v961_v36, %v439_v57 }
 0x27b   :  { %v562_v62 = vsel %vm561_vm12, %v560_v55, %v555_v58  ;;  %v442_v63 = vpop.xlane.xlu0 %441 }
 0x27c   :  { %v569_v0 = vsel %vm568_vm13, %v567_v59, %v562_v62  ;;  %v574_v1 = vrot.slane %v461_v60, %v573_v50  ;;  %v462_v2 = vadd.f32 %v961_v36, %v442_v63 }
 0x27d   :  { %v445_v3 = vpop.xlane.xlu1 %444 }
 0x27e   :  { %v581_v4 = vrot.slane %v462_v2, %v580_v61  ;;  %v463_v5 = vadd.f32 %v961_v36, %v445_v3  ;;  %v576_v6 = vsel %vm575_vm14, %v574_v1, %v569_v0 }
 0x280   :  { %v588_v7 = vrot.slane %v463_v5, %v587_v40  ;;  %v583_v8 = vsel %vm582_vm15, %v581_v4, %v576_v6 }
 0x282   :  { %v590_v9 = vsel %vm589_vm0, %v588_v7, %v583_v8 }
 0x283   :  { %592 = vst [vmem:[#allocation3] sm:$0x1] %v590_v9 }
 0x284   :  { %765 = shalt.err (!%p762_p4)
}
 0x285   :  { %s766_s22 = scalar_lea.hbm %s1033_s7, 16 }
 0x286   :  { %p767_p5 = scmp.ne.s32.totalorder %s1033_s7, %s766_s22  ;;  %p770_p6 = scmp.lt.u32.totalorder %s766_s22, %s1033_s7 }
 0x288   :  { %p772_p7 = pnand %p770_p6, %p767_p5 }
 0x28a   :  { %775 = shalt.err (!%p772_p7)
}
 0x28b   :  { %602 = dma.vmem_to_hbm [thread:$0]  %s600_s17, 16, %s1033_s7, [#allocation4]  }
 0x28c   :  { %776 = dma.done.wait [#allocation4], 16  }
 0x28d   :  { %777 = vsyncadd [#allocation4], 4294967280 }
 0x28e   :  { %606 = vsyncpa [#allocation4], 1 }

</bundles_post_ra>
